<compile_context>
chip_gen: v5e
topology: v5e:2x2
jax: 0.10.0
libtpu: 0.0.40
codegen_flags: <defaults>
</compile_context>

<pallas_src>
import math
import functools

import jax
import jax.numpy as jnp
from jax import lax
from jax.experimental import pallas as pl
from jax.experimental.pallas import tpu as pltpu


# ----------------------------------------------------------------------------
# PE table (plain JAX glue) — replicates the PyTorch buffer pe[:, 0, :].
# ----------------------------------------------------------------------------
def _make_pe_table(d_model: int, max_len: int) -> jnp.ndarray:
    pos = jnp.arange(max_len, dtype=jnp.float32)[:, None]                      # (L, 1)
    div = jnp.exp(jnp.arange(0, d_model, 2, dtype=jnp.float32)
                  * (-math.log(10000.0) / d_model))                            # (ceil(D/2),)
    ang = pos * div                                                            # (L, ceil(D/2))
    pe = jnp.zeros((max_len, d_model), dtype=jnp.float32)
    pe = pe.at[:, 0::2].set(jnp.sin(ang))
    pe = pe.at[:, 1::2].set(jnp.cos(ang)[:, : d_model // 2])  # odd D: truncate cos col
    return pe


# ----------------------------------------------------------------------------
# Stateless dropout bits: 32-bit mix of (seed, global element index).
# Plain jnp integer ops -> lowers on Mosaic and in interpret mode alike.
# ----------------------------------------------------------------------------
def _hash_bits_u32(gid_i32, seed_i32):
    x = gid_i32.astype(jnp.uint32)
    s = seed_i32.astype(jnp.uint32)
    x = x + (s * jnp.uint32(0x9E3779B9) + jnp.uint32(0x7F4A7C15))
    x = x ^ (x >> 16)
    x = x * jnp.uint32(0x7FEB352D)
    x = x ^ (x >> 15)
    x = x * jnp.uint32(0x846CA68B)
    x = x ^ (x >> 16)
    return x


def _apply_dropout(y, gid_i32, seed_i32, p: float):
    # Drop with probability p, scale survivors by 1/(1-p).
    thresh = jnp.uint32(min(int(round(p * (1 << 32))), (1 << 32) - 1))
    bits = _hash_bits_u32(gid_i32, seed_i32)
    scale = jnp.asarray(1.0 / (1.0 - p), dtype=y.dtype)
    return jnp.where(bits >= thresh, y * scale, jnp.zeros_like(y))


# ----------------------------------------------------------------------------
# Kernels
# ----------------------------------------------------------------------------
def _pe_kernel_3d(seed_ref, x_ref, pe_ref, o_ref, *, p: float, training: bool,
                  ts: int, b_dim: int, d_dim: int):
    # x_ref/o_ref: (ts, B, D);  pe_ref: (ts, D).
    # pe broadcast along the batch (sublane) axis — no tiled pe temporary.
    y = x_ref[...] + pe_ref[...][:, None, :]

    if training and p >= 1.0:
        y = jnp.zeros_like(y)
    elif training and p > 0.0:
        row0 = pl.program_id(0) * ts
        rows = lax.broadcasted_iota(jnp.int32, y.shape, 0) + row0
        bs = lax.broadcasted_iota(jnp.int32, y.shape, 1)
        ds_ = lax.broadcasted_iota(jnp.int32, y.shape, 2)
        gid = (rows * b_dim + bs) * d_dim + ds_          # absolute element index
        y = _apply_dropout(y, gid, seed_ref[0], p)

    o_ref[...] = y.astype(o_ref.dtype)


def _pe_kernel_flat(seed_ref, x_ref, pe_ref, o_ref, *, p: float, training: bool,
                    ts: int, batch: int, d_dim: int):
    # x_ref/o_ref: (ts, B*D) lane-dense (B*D % 128 == 0);  pe_ref: (ts, D).
    # pe replicated along lanes in-kernel -> pe HBM traffic stays at 1/B of x.
    pe_b = jnp.tile(pe_ref[...], (1, batch))             # (ts, B*D)
    y = x_ref[...] + pe_b

    if training and p >= 1.0:
        y = jnp.zeros_like(y)
    elif training and p > 0.0:
        row0 = pl.program_id(0) * ts
        rows = lax.broadcasted_iota(jnp.int32, y.shape, 0) + row0
        lanes = lax.broadcasted_iota(jnp.int32, y.shape, 1)
        gid = rows * (batch * d_dim) + lanes              # == (s*B + b)*D + d
        y = _apply_dropout(y, gid, seed_ref[0], p)

    o_ref[...] = y.astype(o_ref.dtype)


# ----------------------------------------------------------------------------
# Tiling / chip heuristics
# ----------------------------------------------------------------------------
def _chip_params():
    vmem_bytes = 128 << 20
    try:
        info = pltpu.get_tpu_info()
        vmem_bytes = int(getattr(info, "vmem_capacity_bytes", vmem_bytes))
    except Exception:
        pass
    if vmem_bytes <= (64 << 20):
        # v7x-like: 64 MiB VMEM per TC, 2 TCs, 3.2 TB/s HBM.
        return dict(target_eval=8 << 20, target_train=6 << 20,
                    vmem_cap=48 << 20, min_steps=4)
    # v5e / v6e: 128 MiB VMEM, single TensorCore.
    return dict(target_eval=12 << 20, target_train=10 << 20,
                vmem_cap=100 << 20, min_steps=1)


def _choose_seq_tile(seq_len: int, row_bytes: int, target_bytes: int,
                     min_steps: int) -> int:
    """Byte-based sequence tile: ~target_bytes per x block, multiple of 8."""
    if seq_len <= 8:
        return seq_len
    ts = (target_bytes // max(row_bytes, 1)) // 8 * 8
    ts = max(8, min(ts, seq_len))
    if min_steps > 1 and ts >= seq_len and seq_len >= 8 * min_steps:
        # Multi-core chip and everything fits one tile: force >= min_steps grid
        # steps (>= 2 per TensorCore) so double-buffering overlaps the DMA.
        chunk = -(-seq_len // min_steps)
        ts = max(8, ((chunk + 7) // 8) * 8)
    return min(ts, seq_len)


# ----------------------------------------------------------------------------
# Wrapper
# ----------------------------------------------------------------------------
def positional_encoding(x: jnp.ndarray,
                        pe_table: jnp.ndarray,
                        *,
                        dropout_p: float = 0.1,
                        training: bool = False,
                        seed: int = 0) -> jnp.ndarray:
    """x: (S, B, D); pe_table: (max_len, D) ideally already in x.dtype."""
    S, B, D = x.shape
    itemsize = jnp.dtype(x.dtype).itemsize

    pe = pe_table[:S]
    if pe.dtype != x.dtype:          # caller should pre-cast; this is a fallback
        pe = pe.astype(x.dtype)

    do_dropout = bool(training) and (0.0 < float(dropout_p))
    cp = _chip_params()
    target = cp["target_train"] if do_dropout else cp["target_eval"]
    row_bytes = B * D * itemsize
    ts = _choose_seq_tile(S, row_bytes, target, cp["min_steps"])
    grid = pl.cdiv(S, ts)

    # VMEM budget: double-buffered x-in / out / pe blocks, plus the u32
    # random-bits temporary (4 B/elem regardless of x dtype) when training.
    x_blk = ts * B * D * itemsize
    pe_blk = ts * D * itemsize
    bits_tmp = ts * B * D * 4 if do_dropout else 0
    needed = 2 * (2 * x_blk + pe_blk) + bits_tmp + (2 << 20)
    vmem_limit = int(min(max(needed, 8 << 20), cp["vmem_cap"]))

    seed_arr = jnp.array([seed], dtype=jnp.int32)
    cost = pl.CostEstimate(flops=S * B * D, transcendentals=0,
                           bytes_accessed=2 * S * B * D * itemsize + S * D * itemsize)
    cparams = pltpu.CompilerParams(dimension_semantics=("parallel",),
                                   vmem_limit_bytes=vmem_limit)

    # Lane-dense flattened path only when it actually pays off: small D with a
    # lane-aligned B*D.  Everything else takes the 3-D broadcast path.
    use_flat = (D < 128) and ((B * D) % 128 == 0)

    if not use_flat:
        kernel = functools.partial(_pe_kernel_3d, p=float(dropout_p),
                                   training=bool(training), ts=ts, b_dim=B, d_dim=D)
        grid_spec = pltpu.PrefetchScalarGridSpec(
            num_scalar_prefetch=1,
            grid=(grid,),
            in_specs=[pl.BlockSpec((ts, B, D), lambda i, _s: (i, 0, 0)),   # x
                      pl.BlockSpec((ts, D),    lambda i, _s: (i, 0))],     # pe
            out_specs=pl.BlockSpec((ts, B, D), lambda i, _s: (i, 0, 0)),
        )
        return pl.pallas_call(
            kernel,
            out_shape=jax.ShapeDtypeStruct((S, B, D), x.dtype),
            grid_spec=grid_spec,
            compiler_params=cparams,
            cost_estimate=cost,
        )(seed_arr, x, pe)

    # Flattened lane-dense path (D < 128, B*D % 128 == 0): unmasked vst's.
    xf = x.reshape(S, B * D)
    kernel = functools.partial(_pe_kernel_flat, p=float(dropout_p),
                               training=bool(training), ts=ts, batch=B, d_dim=D)
    grid_spec = pltpu.PrefetchScalarGridSpec(
        num_scalar_prefetch=1,
        grid=(grid,),
        in_specs=[pl.BlockSpec((ts, B * D), lambda i, _s: (i, 0)),         # x
                  pl.BlockSpec((ts, D),     lambda i, _s: (i, 0))],        # pe
        out_specs=pl.BlockSpec((ts, B * D), lambda i, _s: (i, 0)),
    )
    out_flat = pl.pallas_call(
        kernel,
        out_shape=jax.ShapeDtypeStruct((S, B * D), x.dtype),
        grid_spec=grid_spec,
        compiler_params=cparams,
        cost_estimate=cost,
    )(seed_arr, xf, pe)
    return out_flat.reshape(S, B, D)


# ----------------------------------------------------------------------------
# Demo / self-test
# ----------------------------------------------------------------------------
if __name__ == "__main__":
    MAX_LEN = 64

    # --- 3-D broadcast path: D=32, B=2 (B*D=64, not lane-aligned) --------
    S, B, D = 8, 2, 32
    x = jax.random.normal(jax.random.PRNGKey(0), (S, B, D), dtype=jnp.float32)
    pe_table = _make_pe_table(D, MAX_LEN).astype(x.dtype)   # pre-cast once (hoisted)

    out = positional_encoding(x, pe_table, dropout_p=0.1, training=False)
    out = jax.block_until_ready(out)
    ref = x + pe_table[:S][:, None, :]
    assert out.shape == (S, B, D)
    assert jnp.allclose(out, ref, atol=1e-6), "3-D path eval mismatch"

    # --- flattened lane-dense path: D=32, B=4 (B*D=128) -------------------
    S2, B2, D2 = 16, 4, 32
    x2 = jax.random.normal(jax.random.PRNGKey(1), (S2, B2, D2), dtype=jnp.float32)
    pe_table2 = _make_pe_table(D2, MAX_LEN).astype(x2.dtype)
    out2 = positional_encoding(x2, pe_table2, dropout_p=0.1, training=False)
    out2 = jax.block_until_ready(out2)
    ref2 = x2 + pe_table2[:S2][:, None, :]
    assert jnp.allclose(out2, ref2, atol=1e-6), "flat path eval mismatch"

    # --- training-mode smoke test (stateless hashed dropout) --------------
    p = 0.1
    out_tr = positional_encoding(x, pe_table, dropout_p=p, training=True, seed=123)
    out_tr = jax.block_until_ready(out_tr)
    assert out_tr.shape == (S, B, D)
    scaled = ref * jnp.float32(1.0 / (1.0 - p))
    ok = jnp.all(jnp.where(out_tr == 0, True,
                           jnp.isclose(out_tr, scaled, atol=1e-5, rtol=1e-5)))
    assert bool(ok), "training-mode dropout mismatch"

    print("KERNEL_OK")
</pallas_src>

<mosaic_0001>
module attributes {stable_mosaic.version = 11 : i64} {
  func.func @_pe_kernel_3d(%arg0: i32, %arg1: memref<1xi32, #tpu.memory_space<smem>>, %arg2: memref<8x2x32xf32, #tpu.memory_space<vmem>>, %arg3: memref<8x32xf32, #tpu.memory_space<vmem>>, %arg4: memref<8x2x32xf32, #tpu.memory_space<vmem>>) attributes {dimension_semantics = [#tpu.dimension_semantics<parallel>], iteration_bounds = array<i64: 1>, scalar_prefetch = 1 : i64, scratch_operands = 0 : i64, tpu.core_type = #tpu.core_type<tc>, window_params = [{transform_indices = @transform_0, window_bounds = array<i64: 8, 2, 32>}, {transform_indices = @transform_1, window_bounds = array<i64: 8, 32>}, {transform_indices = @transform_2, window_bounds = array<i64: 8, 2, 32>}]} {
    %c0 = arith.constant 0 : index
    %c0_0 = arith.constant 0 : index
    %c0_1 = arith.constant 0 : index
    %0 = vector.load %arg2[%c0, %c0_0, %c0_1] : memref<8x2x32xf32, #tpu.memory_space<vmem>>, vector<8x2x32xf32>
    %c0_2 = arith.constant 0 : index
    %c0_3 = arith.constant 0 : index
    %1 = vector.load %arg3[%c0_2, %c0_3] : memref<8x32xf32, #tpu.memory_space<vmem>>, vector<8x32xf32>
    %2 = vector.shape_cast %1 : vector<8x32xf32> to vector<8x1x32xf32>
    %3 = vector.broadcast %2 : vector<8x1x32xf32> to vector<8x2x32xf32>
    %4 = arith.addf %0, %3 : vector<8x2x32xf32>
    %c0_4 = arith.constant 0 : index
    %c0_5 = arith.constant 0 : index
    %c0_6 = arith.constant 0 : index
    %5 = vector.load %arg4[%c0_4, %c0_5, %c0_6] : memref<8x2x32xf32, #tpu.memory_space<vmem>>, vector<8x2x32xf32>
    tpu.vector_store %arg4[%c0_4, %c0_5, %c0_6], %4 {strides = array<i32>} : memref<8x2x32xf32, #tpu.memory_space<vmem>>, vector<8x2x32xf32>,
    return
  }
  func.func @transform_0(%arg0: i32, %arg1: memref<1xi32, #tpu.memory_space<smem>>) -> (i32, i32, i32) {
    %c0_i32 = arith.constant 0 : i32
    %c0_i32_0 = arith.constant 0 : i32
    %c0_i32_1 = arith.constant 0 : i32
    return %arg0, %c0_i32, %c0_i32_0 : i32, i32, i32
  }
  func.func @transform_1(%arg0: i32, %arg1: memref<1xi32, #tpu.memory_space<smem>>) -> (i32, i32) {
    %c0_i32 = arith.constant 0 : i32
    %c0_i32_0 = arith.constant 0 : i32
    return %arg0, %c0_i32 : i32, i32
  }
  func.func @transform_2(%arg0: i32, %arg1: memref<1xi32, #tpu.memory_space<smem>>) -> (i32, i32, i32) {
    %c0_i32 = arith.constant 0 : i32
    %c0_i32_0 = arith.constant 0 : i32
    %c0_i32_1 = arith.constant 0 : i32
    return %arg0, %c0_i32, %c0_i32_0 : i32, i32, i32
  }
}

</mosaic_0001>

<bundles_post_ra>
// kernel: tpu_custom_call.1
= control target key start
LH: loop header
LB: loop body
LE: loop exit
PB: predicated region body
PF: predicated region fallthrough
CT: control target
= control target key end

     0   :  { %9 = vsyncpa [#allocation5], 0  ;;  %s245_s0 = inlined_call_operand.<no memory space> [shape: s32[1], index: 0, kind: input, shape index: {}]   ;;  %s246_s1 = inlined_call_operand.hbm [shape: f32[8,2,32], index: 1, kind: input, shape index: {}]   ;;  %s247_s2 = inlined_call_operand.hbm [shape: f32[8,32], index: 2, kind: input, shape index: {}]   ;;  %s248_s3 = inlined_call_operand.hbm [shape: f32[8,2,32], index: 3, kind: output, shape index: {}]  }
   0x1   :  { %10 = vsyncpa [#allocation8], 0 }
   0x2   :  { %11 = vsyncpa [#allocation6], 0  ;;  %s16_s14 = sshll.u32 %s246_s1, 4  ;;  %s197_s15 = smov [#allocation4]   ;;  %s17_s14 = int_to_ptr.hbm [resolvable:$true] %s16_s14 }
   0x3   :  { %s18_s16 = sshll.u32 %s197_s15, 4  ;;  %s30_s18 = sshll.u32 %s247_s2, 4  ;;  %s19_s16 = int_to_ptr.vmem [resolvable:$true] %s18_s16  ;;  %s31_s18 = int_to_ptr.hbm [resolvable:$true] %s30_s18 }
   0x4   :  { %s198_s19 = smov 32   ;;  %s199_s20 = smov 2  }
   0x5   :  { %24 = dma.hbm_to_vmem [thread:$0]  %s17_s14, 256, %s19_s16, [#allocation5], %s198_s19, %s198_s19, %s199_s20  }
   0x6   :  { %s200_s21 = smov [#allocation7]  }
   0x7   :  { %s32_s22 = sshll.u32 %s200_s21, 4  ;;  %s33_s22 = int_to_ptr.vmem [resolvable:$true] %s32_s22 }
   0x8   :  { %35 = dma.hbm_to_vmem [thread:$0]  %s31_s18, 128, %s33_s22, [#allocation8]  }
   0x9   :  { %191 = dma.done.wait [#allocation5], 256  }
   0xa   :  { %192 = vsyncadd [#allocation5], 4294967040 }
   0xb   :  { %193 = dma.done.wait [#allocation8], 128  }
   0xc   :  { %194 = vsyncadd [#allocation8], 4294967168  ;;  %v44_v0 = vld [vmem:[#allocation4] sm:$0x3]  ;;  %v52_v1 = vld [vmem:[#allocation7] sm:$0xff]  ;;  %vm85_vm0 = vcmask 254976  }
   0xd   :  { %v61_v2 = vperm.slane %v52_v1, 0  ;;  %v45_v3 = vld [vmem:[#allocation4 + $0x2] sm:$0x3]  ;;  %v54_v4 = vrot.slane %v52_v1, 1  ;;  %v55_v5 = vrot.slane %v52_v1, 2  ;;  %v56_v6 = vrot.slane %v52_v1, 3 }
   0xe   :  { %v46_v7 = vld [vmem:[#allocation4 + $0x4] sm:$0x3]  ;;  %v47_v8 = vld [vmem:[#allocation4 + $0x6] sm:$0x3]  ;;  %v57_v9 = vrot.slane %v52_v1, 4  ;;  %v58_v10 = vrot.slane %v52_v1, 5 }
   0xf   :  { %v77_v11 = vadd.f32 %v61_v2, %v44_v0  ;;  %v62_v12 = vperm.slane %v54_v4, 0  ;;  %v63_v13 = vperm.slane %v55_v5, 0  ;;  %v64_v14 = vperm.slane %v56_v6, 0  ;;  %v48_v15 = vld [vmem:[#allocation4 + $0x8] sm:$0x3]  ;;  %s201_s1 = smov [#allocation9]  }
  0x10   :  { %v65_v16 = vperm.slane %v57_v9, 0  ;;  %v49_v17 = vld [vmem:[#allocation4 + $0xa] sm:$0x3]  ;;  %v66_v18 = vperm.slane %v58_v10, 0  ;;  %v59_v19 = vrot.slane %v52_v1, 6  ;;  %v60_v20 = vrot.slane %v52_v1, 7 }
  0x11   :  { %86 = vst.msk [vmem:[#allocation9] sm:$0x3] %vm85_vm0, %v77_v11  ;;  %v78_v21 = vadd.f32 %v62_v12, %v45_v3  ;;  %v79_v22 = vadd.f32 %v63_v13, %v46_v7  ;;  %v80_v23 = vadd.f32 %v64_v14, %v47_v8  ;;  %v50_v24 = vld [vmem:[#allocation4 + $0xc] sm:$0x3]  ;;  %v51_v27 = vld [vmem:[#allocation4 + $0xe] sm:$0x3] }
  0x12   :  { %v81_v25 = vadd.f32 %v65_v16, %v48_v15  ;;  %v67_v26 = vperm.slane %v59_v19, 0  ;;  %v68_v28 = vperm.slane %v60_v20, 0  ;;  %v82_v29 = vadd.f32 %v66_v18, %v49_v17  ;;  %s98_s2 = sshll.u32 %s201_s1, 4  ;;  %s100_s25 = sshll.u32 %s248_s3, 4  ;;  %s99_s2 = int_to_ptr.vmem [resolvable:$true] %s98_s2  ;;  %s101_s25 = int_to_ptr.hbm [resolvable:$true] %s100_s25 }
  0x13   :  { %87 = vst.msk [vmem:[#allocation9 + $0x2] sm:$0x3] %vm85_vm0, %v78_v21 }
  0x14   :  { %88 = vst.msk [vmem:[#allocation9 + $0x4] sm:$0x3] %vm85_vm0, %v79_v22  ;;  %v83_v30 = vadd.f32 %v67_v26, %v50_v24  ;;  %v84_v31 = vadd.f32 %v68_v28, %v51_v27 }
  0x15   :  { %89 = vst.msk [vmem:[#allocation9 + $0x6] sm:$0x3] %vm85_vm0, %v80_v23 }
  0x16   :  { %90 = vst.msk [vmem:[#allocation9 + $0x8] sm:$0x3] %vm85_vm0, %v81_v25 }
  0x17   :  { %91 = vst.msk [vmem:[#allocation9 + $0xa] sm:$0x3] %vm85_vm0, %v82_v29 }
  0x18   :  { %92 = vst.msk [vmem:[#allocation9 + $0xc] sm:$0x3] %vm85_vm0, %v83_v30 }
  0x19   :  { %93 = vst.msk [vmem:[#allocation9 + $0xe] sm:$0x3] %vm85_vm0, %v84_v31 }
  0x1a   :  { %106 = dma.vmem_to_hbm [thread:$0]  %s99_s2, 256, %s101_s25, [#allocation6], %s198_s19, %s198_s19, %s199_s20  }
  0x1b   :  { %195 = dma.done.wait [#allocation6], 256  }
  0x1c   :  { %196 = vsyncadd [#allocation6], 4294967040 }
  0x1d   :  { %111 = vsyncpa [#allocation5], 1 }
  0x1e   :  { %112 = vsyncpa [#allocation8], 1 }
  0x1f   :  { %113 = vsyncpa [#allocation6], 1 }

</bundles_post_ra>
